<compile_context>
chip_gen: v5e
topology: v5e:2x2
jax: 0.10.0
libtpu: 0.0.40
codegen_flags: <defaults>
</compile_context>

<pallas_src>
import jax
import jax.numpy as jnp
from jax.experimental import pallas as pl
from jax.experimental.pallas import tpu as pltpu

_EDGE_BLOCK = 128   # edge-tile size: bounds the O(E_blk*N) one-hot slabs in VMEM
_DMA_RING = 8       # fixed-size DMA-semaphore ring for row gather / scatter


# ----------------------------------------------------------------------------
# Fused kernel: gather -> GCNConv -> GELU -> Linear -> residual -> scatter back
# ----------------------------------------------------------------------------
def _gcn_adapter_kernel(mask_ref,      # SMEM [N]         int32  flat row ids into x
                        src_ref,       # VMEM [EP, 1]     int32  edge sources (-1 = pad)
                        dst_t_ref,     # VMEM [1, EP]     int32  edge targets (-1 = pad)
                        x_ref,         # ANY  [BS, D]     x.dtype full hidden states (HBM)
                        w1_ref,        # VMEM [D, HP]     f32    GCNConv weight (lane-padded)
                        b1_ref,        # VMEM [1, HP]     f32    GCNConv bias   (lane-padded)
                        w2_ref,        # VMEM [HP, D]     f32    output Linear weight
                        b2_ref,        # VMEM [1, D]      f32    output Linear bias
                        x_out_ref,     # ANY  [BS, D]     x.dtype aliased with x_ref
                        nodes_raw,     # VMEM [N, D]      x.dtype gathered node rows
                        out_vmem,      # VMEM [N, D]      x.dtype residual-updated rows
                        gather_sem,    # DMA sems (_DMA_RING,)
                        scatter_sem):  # DMA sems (_DMA_RING,)
    n_nodes = nodes_raw.shape[0]
    e_pad = src_ref.shape[0]
    hp = w1_ref.shape[1]
    n_eblk = e_pad // _EDGE_BLOCK

    # -- 1) issue ALL row-gather DMAs (x[mask] -> VMEM); do NOT wait yet ------
    @pl.loop(0, n_nodes)
    def _gather_start(i):
        row = mask_ref[i]
        pltpu.make_async_copy(x_ref.at[pl.ds(row, 1)],
                              nodes_raw.at[pl.ds(i, 1)],
                              gather_sem.at[i % _DMA_RING]).start()

    # -- 2) edge-structure math (degree, D^-1/2): needs no node features, so it
    #       runs while the gather DMAs are in flight and hides their latency. -
    row_iota = jax.lax.broadcasted_iota(jnp.int32, (n_nodes, _EDGE_BLOCK), 0)
    col_iota = jax.lax.broadcasted_iota(jnp.int32, (_EDGE_BLOCK, n_nodes), 1)

    def _deg_body(b, deg):
        off = pl.multiple_of(b * _EDGE_BLOCK, _EDGE_BLOCK)
        dst_blk = dst_t_ref[:, pl.ds(off, _EDGE_BLOCK)]               # [1, EB]
        onehot_dst_t = (dst_blk == row_iota).astype(jnp.float32)      # [N, EB]
        return deg + jnp.sum(onehot_dst_t, axis=1, keepdims=True)     # [N, 1]

    deg = jax.lax.fori_loop(0, n_eblk, _deg_body,
                            jnp.zeros((n_nodes, 1), jnp.float32))
    # deg over destinations == PyG gcn_norm(add_self_loops=False)
    dinv = jnp.where(deg > 0.0, jax.lax.rsqrt(jnp.maximum(deg, 1.0)), 0.0)

    # -- 3) wait for the gathers (shape-matched waits on the ring slots) ------
    @pl.loop(0, n_nodes)
    def _gather_wait(i):
        pltpu.make_async_copy(x_ref.at[pl.ds(0, 1)],
                              nodes_raw.at[pl.ds(i, 1)],
                              gather_sem.at[i % _DMA_RING]).wait()

    nodes = nodes_raw[...].astype(jnp.float32)                        # [N, D]

    # -- 4) GCNConv: feature transform + normalized aggregation (edge-tiled) --
    xw = jnp.dot(nodes, w1_ref[...],
                 preferred_element_type=jnp.float32)                  # [N, HP]
    # A_hat @ xw == diag(dinv) . S_dst^T @ (S_src @ (diag(dinv) . xw)),
    # accumulated over 128-edge blocks so nothing O(E*N) is materialized.
    scaled = dinv * xw                                                # [N, HP]

    def _agg_body(b, acc):
        off = pl.multiple_of(b * _EDGE_BLOCK, _EDGE_BLOCK)
        src_blk = src_ref[pl.ds(off, _EDGE_BLOCK), :]                 # [EB, 1]
        onehot_src = (src_blk == col_iota).astype(jnp.float32)        # [EB, N]
        ef = jnp.dot(onehot_src, scaled,
                     preferred_element_type=jnp.float32)              # [EB, HP]
        dst_blk = dst_t_ref[:, pl.ds(off, _EDGE_BLOCK)]               # [1, EB]
        onehot_dst_t = (dst_blk == row_iota).astype(jnp.float32)      # [N, EB]
        return acc + jnp.dot(onehot_dst_t, ef,
                             preferred_element_type=jnp.float32)      # [N, HP]

    agg = jax.lax.fori_loop(0, n_eblk, _agg_body,
                            jnp.zeros((n_nodes, hp), jnp.float32))

    h = dinv * agg + b1_ref[...]                                      # [N, HP]

    # Exact GELU (erf-based), matching torch.nn.GELU() default.
    inv_sqrt2 = jnp.float32(0.7071067811865476)
    h = 0.5 * h * (1.0 + jax.lax.erf(h * inv_sqrt2))

    # -- output projection + residual, back to x's native dtype ---------------
    out = jnp.dot(h, w2_ref[...],
                  preferred_element_type=jnp.float32) + b2_ref[...]   # [N, D]
    out_vmem[...] = (nodes + out).astype(out_vmem.dtype)

    # -- 5) scatter updated rows back into the aliased output (x) buffer ------
    @pl.loop(0, n_nodes)
    def _scatter_start(i):
        row = mask_ref[i]
        pltpu.make_async_copy(out_vmem.at[pl.ds(i, 1)],
                              x_out_ref.at[pl.ds(row, 1)],
                              scatter_sem.at[i % _DMA_RING]).start()

    @pl.loop(0, n_nodes)
    def _scatter_wait(i):
        pltpu.make_async_copy(out_vmem.at[pl.ds(0, 1)],
                              x_out_ref.at[pl.ds(0, 1)],
                              scatter_sem.at[i % _DMA_RING]).wait()


def _pad_to(v, m):
    return ((v + m - 1) // m) * m


# ----------------------------------------------------------------------------
# Wrapper. x stays in HBM in its native dtype; only weight / edge padding
# happens in XLA. mask_idx must contain UNIQUE flat indices (as x[mask] does).
# ----------------------------------------------------------------------------
@jax.jit
def graph_conv_adapter_forward(x, mask_idx, edges, w1, b1, w2, b2):
    """x: [B,S,D]; mask_idx: [N] unique flat indices into B*S (the boolean-mask
    positions, static N); edges: [2,E] int32 over the N gathered nodes
    (row 0 = src, row 1 = dst). Returns the tensor part of (x, None, None)."""
    B, S, D = x.shape
    N = int(mask_idx.shape[0])
    E = int(edges.shape[1])
    H = int(w1.shape[1])

    # Lane-dense padding of graph_hid_dim (exact: padded columns stay zero
    # through GELU and the padded rows of W2 are zero).
    HP = max(128, _pad_to(H, 128))
    w1p = jnp.zeros((D, HP), jnp.float32).at[:, :H].set(w1.astype(jnp.float32))
    b1p = jnp.zeros((1, HP), jnp.float32).at[:, :H].set(
        b1.astype(jnp.float32).reshape(1, H))
    w2p = jnp.zeros((HP, D), jnp.float32).at[:H, :].set(w2.astype(jnp.float32))
    b2r = b2.astype(jnp.float32).reshape(1, D)

    # Pad the edge list to an MXU-aligned multiple of 128 with -1 sentinels
    # (sentinels contribute nothing to degree or aggregation).
    EP = _pad_to(max(E, 1), _EDGE_BLOCK)
    src = jnp.full((EP, 1), -1, jnp.int32).at[:E, 0].set(edges[0].astype(jnp.int32))
    dst_t = jnp.full((1, EP), -1, jnp.int32).at[0, :E].set(edges[1].astype(jnp.int32))

    # x stays in its native dtype; only the N masked rows are ever DMA'd.
    x_flat = x.reshape(B * S, D)
    x_item = jnp.dtype(x_flat.dtype).itemsize

    cost = pl.CostEstimate(
        flops=4 * N * HP * (D + EP),
        transcendentals=N * HP,
        bytes_accessed=(2 * N * D * x_item
                        + 4 * (D * HP + HP + HP * D + D)
                        + 4 * 2 * EP + 4 * N),
    )

    # Explicit VMEM budget: scratch rows + weights + edge lists + activations
    # + per-edge-block one-hot slabs, with 2x headroom (portable to v5e's
    # 16 MiB scoped default and below v7x's 64 MiB physical VMEM).
    vmem_need = (2 * N * D * x_item
                 + 4 * (D * HP + HP + HP * D + D)
                 + 4 * 2 * EP
                 + 4 * (3 * N * HP + N * D)
                 + 4 * (2 * _EDGE_BLOCK * N + _EDGE_BLOCK * HP))
    vmem_limit = int(min(max(2 * vmem_need, 32 << 20), 96 << 20))

    out_flat = pl.pallas_call(
        _gcn_adapter_kernel,
        out_shape=jax.ShapeDtypeStruct((B * S, D), x_flat.dtype),
        in_specs=[
            pl.BlockSpec(memory_space=pltpu.MemorySpace.SMEM),   # mask_idx
            pl.BlockSpec(memory_space=pltpu.MemorySpace.VMEM),   # src  [EP,1]
            pl.BlockSpec(memory_space=pltpu.MemorySpace.VMEM),   # dst  [1,EP]
            pl.BlockSpec(memory_space=pl.ANY),                   # x_flat (HBM)
            pl.BlockSpec(memory_space=pltpu.MemorySpace.VMEM),   # w1 padded
            pl.BlockSpec(memory_space=pltpu.MemorySpace.VMEM),   # b1 padded
            pl.BlockSpec(memory_space=pltpu.MemorySpace.VMEM),   # w2 padded
            pl.BlockSpec(memory_space=pltpu.MemorySpace.VMEM),   # b2
        ],
        out_specs=pl.BlockSpec(memory_space=pl.ANY),
        scratch_shapes=[
            pltpu.VMEM((N, D), x_flat.dtype),        # gathered node rows
            pltpu.VMEM((N, D), x_flat.dtype),        # residual-updated rows
            pltpu.SemaphoreType.DMA((_DMA_RING,)),   # gather semaphore ring
            pltpu.SemaphoreType.DMA((_DMA_RING,)),   # scatter semaphore ring
        ],
        # x_flat <-> output buffer: only the N masked rows are rewritten,
        # everything else is the untouched aliased input data.
        input_output_aliases={3: 0},
        compiler_params=pltpu.CompilerParams(vmem_limit_bytes=vmem_limit),
        cost_estimate=cost,
    )(mask_idx.astype(jnp.int32), src, dst_t, x_flat, w1p, b1p, w2p, b2r)

    return out_flat.reshape(B, S, D)


# ----------------------------------------------------------------------------
# Pure-JAX reference (mirrors the PyTorch module) for a runtime sanity check.
# ----------------------------------------------------------------------------
def _reference_forward(x, mask_idx, edges, w1, b1, w2, b2):
    B, S, D = x.shape
    N = mask_idx.shape[0]
    xf = x.reshape(B * S, D)
    nodes = xf[mask_idx]
    src, dst = edges[0], edges[1]
    deg = jnp.zeros((N,), jnp.float32).at[dst].add(1.0)
    dinv = jnp.where(deg > 0, jax.lax.rsqrt(jnp.maximum(deg, 1.0)), 0.0)
    norm = dinv[src] * dinv[dst]
    adj = jnp.zeros((N, N), jnp.float32).at[dst, src].add(norm)
    h = adj @ (nodes @ w1) + b1
    h = 0.5 * h * (1.0 + jax.lax.erf(h * jnp.float32(0.7071067811865476)))
    out = h @ w2 + b2
    xf = xf.at[mask_idx].set(nodes + out)
    return xf.reshape(B, S, D)


if __name__ == "__main__":
    # Small shapes consistent with the module: input_dim = graph_hid_dim = 32.
    B, S, D, H = 2, 16, 32, 32

    key = jax.random.PRNGKey(0)
    k_x, k_w1, k_b1, k_w2, k_b2 = jax.random.split(key, 5)

    x = jax.random.normal(k_x, (B, S, D), dtype=jnp.float32)

    # Deterministic mask: every other sequence position in each batch -> N = 16.
    # (Indices are unique, as required by x[mask] semantics.)
    mask_idx = jnp.array(
        [b * S + s for b in range(B) for s in range(0, S, 2)], dtype=jnp.int32)
    N = mask_idx.shape[0]

    # Deterministic edges: bidirectional ring over the N masked nodes.
    fwd = jnp.arange(N, dtype=jnp.int32)
    edges = jnp.stack(
        [jnp.concatenate([fwd, (fwd + 1) % N]),
         jnp.concatenate([(fwd + 1) % N, fwd])], axis=0)            # [2, 2N]

    # Deterministic synthetic parameters (GCNConv weight/bias, output Linear).
    w1 = jax.random.normal(k_w1, (D, H), dtype=jnp.float32) * 0.05
    b1 = jax.random.normal(k_b1, (1, H), dtype=jnp.float32) * 0.05
    w2 = jax.random.normal(k_w2, (H, D), dtype=jnp.float32) * 0.05
    b2 = jax.random.normal(k_b2, (1, D), dtype=jnp.float32) * 0.05

    out = graph_conv_adapter_forward(x, mask_idx, edges, w1, b1, w2, b2)
    out = jax.block_until_ready(out)

    ref = _reference_forward(x, mask_idx, edges, w1, b1, w2, b2)
    assert out.shape == (B, S, D) and out.dtype == jnp.float32
    assert bool(jnp.allclose(out, ref, atol=1e-4, rtol=1e-4)), \
        float(jnp.abs(out - ref).max())
    print("KERNEL_OK")
</pallas_src>

<mosaic_0001>
module attributes {stable_mosaic.version = 11 : i64} {
  func.func @_gcn_adapter_kernel(%arg0: memref<16xi32, #tpu.memory_space<smem>>, %arg1: memref<128x1xi32, #tpu.memory_space<vmem>>, %arg2: memref<1x128xi32, #tpu.memory_space<vmem>>, %arg3: memref<32x32xf32, #tpu.memory_space<any>>, %arg4: memref<32x128xf32, #tpu.memory_space<vmem>>, %arg5: memref<1x128xf32, #tpu.memory_space<vmem>>, %arg6: memref<128x32xf32, #tpu.memory_space<vmem>>, %arg7: memref<1x32xf32, #tpu.memory_space<vmem>>, %arg8: memref<32x32xf32, #tpu.memory_space<any>>, %arg9: memref<16x32xf32, #tpu.memory_space<vmem>>, %arg10: memref<16x32xf32, #tpu.memory_space<vmem>>, %arg11: memref<8x!tpu.dma_semaphore, #tpu.memory_space<semaphore_mem>>, %arg12: memref<8x!tpu.dma_semaphore, #tpu.memory_space<semaphore_mem>>) attributes {dimension_semantics = [], scalar_prefetch = 0 : i64, scratch_operands = 4 : i64, tpu.core_type = #tpu.core_type<tc>} {
    %c0_i32 = arith.constant 0 : i32
    %c16_i32 = arith.constant 16 : i32
    %0 = arith.addi %c0_i32, %c16_i32 : i32
    %c1_i32 = arith.constant 1 : i32
    scf.for %arg13 = %c0_i32 to %0 step %c1_i32  : i32 {
      %c1_i32_44 = arith.constant 1 : i32
      %68 = arith.muli %arg13, %c1_i32_44 : i32
      %c0_i32_45 = arith.constant 0 : i32
      %69 = arith.addi %c0_i32_45, %68 : i32
      %70 = arith.index_cast %69 : i32 to index
      %71 = memref.load %arg0[%70] : memref<16xi32, #tpu.memory_space<smem>>
      %c8_i32 = arith.constant 8 : i32
      %c0_i32_46 = arith.constant 0 : i32
      %72 = arith.cmpi eq, %c8_i32, %c0_i32_46 : i32
      %c1_i32_47 = arith.constant 1 : i32
      %73 = arith.select %72, %c1_i32_47, %c8_i32 : i32
      %74 = arith.remsi %69, %73 : i32
      %c0_i32_48 = arith.constant 0 : i32
      %75 = arith.cmpi ne, %74, %c0_i32_48 : i32
      %c0_i32_49 = arith.constant 0 : i32
      %76 = arith.cmpi slt, %74, %c0_i32_49 : i32
      %c0_i32_50 = arith.constant 0 : i32
      %77 = arith.cmpi slt, %73, %c0_i32_50 : i32
      %78 = arith.xori %76, %77 : i1
      %79 = arith.andi %78, %75 : i1
      %80 = arith.addi %74, %73 : i32
      %81 = arith.select %79, %80, %74 : i32
      %c0_i32_51 = arith.constant 0 : i32
      %82 = tpu.memref_slice %arg3[%71, %c0_i32_51] : memref<32x32xf32, #tpu.memory_space<any>> -> memref<1x32xf32, #tpu.memory_space<any>>
      %c0_i32_52 = arith.constant 0 : i32
      %83 = tpu.memref_slice %arg9[%69, %c0_i32_52] : memref<16x32xf32, #tpu.memory_space<vmem>> -> memref<1x32xf32, #tpu.memory_space<vmem>>
      %84 = tpu.memref_slice %arg11[%81] : memref<8x!tpu.dma_semaphore, #tpu.memory_space<semaphore_mem>> -> memref<1x!tpu.dma_semaphore, #tpu.memory_space<semaphore_mem>>
      %85 = tpu.memref_squeeze %84 : memref<1x!tpu.dma_semaphore, #tpu.memory_space<semaphore_mem>> -> memref<!tpu.dma_semaphore, #tpu.memory_space<semaphore_mem>>
      tpu.enqueue_dma source(%82 : memref<1x32xf32, #tpu.memory_space<any>>) target(%83 : memref<1x32xf32, #tpu.memory_space<vmem>>) target_semaphore(%85 : memref<!tpu.dma_semaphore, #tpu.memory_space<semaphore_mem>>)
    }
    %c16_i32_0 = arith.constant 16 : i32
    %1 = tpu.iota {dimensions = array<i32: 0>} : vector<16x128xi32>
    %2 = tpu.iota {dimensions = array<i32: 1>} : vector<128x16xi32>
    %cst = arith.constant 0.000000e+00 : f32
    %3 = vector.broadcast %cst : f32 to vector<16x1xf32>
    %c0_i32_1 = arith.constant 0 : i32
    %c128_i32 = arith.constant 128 : i32
    %4 = arith.muli %c0_i32_1, %c128_i32 : i32
    %5 = tpu.assume_multiple %4, 128 : i32
    %c0 = arith.constant 0 : index
    %6 = arith.index_cast %5 : i32 to index
    %7 = vector.load %arg2[%c0, %6] : memref<1x128xi32, #tpu.memory_space<vmem>>, vector<1x128xi32>
    %8 = vector.broadcast %7 : vector<1x128xi32> to vector<16x128xi32>
    %9 = arith.cmpi eq, %8, %1 : vector<16x128xi32>
    %10 = arith.extui %9 : vector<16x128xi1> to vector<16x128xi32>
    %11 = arith.sitofp %10 : vector<16x128xi32> to vector<16x128xf32>
    %cst_2 = arith.constant dense<0.000000e+00> : vector<16xf32>
    %12 = vector.multi_reduction <add>, %11, %cst_2 [1] : vector<16x128xf32> to vector<16xf32>
    %13 = vector.shape_cast %12 : vector<16xf32> to vector<16x1xf32>
    %14 = arith.addf %3, %13 : vector<16x1xf32>
    %c1_i32_3 = arith.constant 1 : i32
    %cst_4 = arith.constant 0.000000e+00 : f32
    %15 = vector.broadcast %cst_4 : f32 to vector<16x1xf32>
    %16 = arith.cmpf ogt, %14, %15 : vector<16x1xf32>
    %cst_5 = arith.constant 1.000000e+00 : f32
    %17 = vector.broadcast %cst_5 : f32 to vector<16x1xf32>
    %18 = arith.maximumf %14, %17 : vector<16x1xf32>
    %19 = math.rsqrt %18 : vector<16x1xf32>
    %cst_6 = arith.constant 0.000000e+00 : f32
    %20 = vector.broadcast %cst_6 : f32 to vector<16x1xf32>
    %21 = arith.select %16, %19, %20 : vector<16x1xi1>, vector<16x1xf32>
    %c0_i32_7 = arith.constant 0 : i32
    %c16_i32_8 = arith.constant 16 : i32
    %22 = arith.addi %c0_i32_7, %c16_i32_8 : i32
    %c1_i32_9 = arith.constant 1 : i32
    scf.for %arg13 = %c0_i32_7 to %22 step %c1_i32_9  : i32 {
      %c1_i32_44 = arith.constant 1 : i32
      %68 = arith.muli %arg13, %c1_i32_44 : i32
      %c0_i32_45 = arith.constant 0 : i32
      %69 = arith.addi %c0_i32_45, %68 : i32
      %c8_i32 = arith.constant 8 : i32
      %c0_i32_46 = arith.constant 0 : i32
      %70 = arith.cmpi eq, %c8_i32, %c0_i32_46 : i32
      %c1_i32_47 = arith.constant 1 : i32
      %71 = arith.select %70, %c1_i32_47, %c8_i32 : i32
      %72 = arith.remsi %69, %71 : i32
      %c0_i32_48 = arith.constant 0 : i32
      %73 = arith.cmpi ne, %72, %c0_i32_48 : i32
      %c0_i32_49 = arith.constant 0 : i32
      %74 = arith.cmpi slt, %72, %c0_i32_49 : i32
      %c0_i32_50 = arith.constant 0 : i32
      %75 = arith.cmpi slt, %71, %c0_i32_50 : i32
      %76 = arith.xori %74, %75 : i1
      %77 = arith.andi %76, %73 : i1
      %78 = arith.addi %72, %71 : i32
      %79 = arith.select %77, %78, %72 : i32
      %c0_i32_51 = arith.constant 0 : i32
      %c0_i32_52 = arith.constant 0 : i32
      %80 = tpu.memref_slice %arg3[%c0_i32_51, %c0_i32_52] : memref<32x32xf32, #tpu.memory_space<any>> -> memref<1x32xf32, #tpu.memory_space<any>>
      %c0_i32_53 = arith.constant 0 : i32
      %81 = tpu.memref_slice %arg9[%69, %c0_i32_53] : memref<16x32xf32, #tpu.memory_space<vmem>> -> memref<1x32xf32, #tpu.memory_space<vmem>>
      %82 = tpu.memref_slice %arg11[%79] : memref<8x!tpu.dma_semaphore, #tpu.memory_space<semaphore_mem>> -> memref<1x!tpu.dma_semaphore, #tpu.memory_space<semaphore_mem>>
      %83 = tpu.memref_squeeze %82 : memref<1x!tpu.dma_semaphore, #tpu.memory_space<semaphore_mem>> -> memref<!tpu.dma_semaphore, #tpu.memory_space<semaphore_mem>>
      tpu.wait_dma2 semaphore(%83 : memref<!tpu.dma_semaphore, #tpu.memory_space<semaphore_mem>>) src(%80 : memref<1x32xf32, #tpu.memory_space<any>>) dst(%81 : memref<1x32xf32, #tpu.memory_space<vmem>>)
    }
    %c16_i32_10 = arith.constant 16 : i32
    %c0_11 = arith.constant 0 : index
    %c0_12 = arith.constant 0 : index
    %23 = vector.load %arg9[%c0_11, %c0_12] : memref<16x32xf32, #tpu.memory_space<vmem>>, vector<16x32xf32>
    %c0_13 = arith.constant 0 : index
    %c0_14 = arith.constant 0 : index
    %24 = vector.load %arg4[%c0_13, %c0_14] : memref<32x128xf32, #tpu.memory_space<vmem>>, vector<32x128xf32>
    %cst_15 = arith.constant dense<0.000000e+00> : vector<16x128xf32>
    %25 = tpu.matmul %23, %24, %cst_15 {dimension_numbers = #tpu.dot_dimension_numbers<[1], [0], [0], [1], [0, 0, 1, 1], [], []>} : vector<16x32xf32>, vector<32x128xf32>, vector<16x128xf32> -> vector<16x128xf32>
    %26 = vector.broadcast %21 : vector<16x1xf32> to vector<16x128xf32>
    %27 = arith.mulf %26, %25 : vector<16x128xf32>
    %cst_16 = arith.constant 0.000000e+00 : f32
    %28 = vector.broadcast %cst_16 : f32 to vector<16x128xf32>
    %c0_i32_17 = arith.constant 0 : i32
    %c128_i32_18 = arith.constant 128 : i32
    %29 = arith.muli %c0_i32_17, %c128_i32_18 : i32
    %30 = tpu.assume_multiple %29, 128 : i32
    %31 = arith.index_cast %30 : i32 to index
    %c0_19 = arith.constant 0 : index
    %32 = vector.load %arg1[%31, %c0_19] : memref<128x1xi32, #tpu.memory_space<vmem>>, vector<128x1xi32>
    %33 = vector.broadcast %32 : vector<128x1xi32> to vector<128x16xi32>
    %34 = arith.cmpi eq, %33, %2 : vector<128x16xi32>
    %35 = arith.extui %34 : vector<128x16xi1> to vector<128x16xi32>
    %36 = arith.sitofp %35 : vector<128x16xi32> to vector<128x16xf32>
    %cst_20 = arith.constant dense<0.000000e+00> : vector<128x128xf32>
    %37 = tpu.matmul %36, %27, %cst_20 {dimension_numbers = #tpu.dot_dimension_numbers<[1], [0], [0], [1], [0, 0, 1, 1], [], []>} : vector<128x16xf32>, vector<16x128xf32>, vector<128x128xf32> -> vector<128x128xf32>
    %c0_21 = arith.constant 0 : index
    %38 = arith.index_cast %30 : i32 to index
    %39 = vector.load %arg2[%c0_21, %38] : memref<1x128xi32, #tpu.memory_space<vmem>>, vector<1x128xi32>
    %40 = vector.broadcast %39 : vector<1x128xi32> to vector<16x128xi32>
    %41 = arith.cmpi eq, %40, %1 : vector<16x128xi32>
    %42 = arith.extui %41 : vector<16x128xi1> to vector<16x128xi32>
    %43 = arith.sitofp %42 : vector<16x128xi32> to vector<16x128xf32>
    %cst_22 = arith.constant dense<0.000000e+00> : vector<16x128xf32>
    %44 = tpu.matmul %43, %37, %cst_22 {dimension_numbers = #tpu.dot_dimension_numbers<[1], [0], [0], [1], [0, 0, 1, 1], [], []>} : vector<16x128xf32>, vector<128x128xf32>, vector<16x128xf32> -> vector<16x128xf32>
    %45 = arith.addf %28, %44 : vector<16x128xf32>
    %c1_i32_23 = arith.constant 1 : i32
    %46 = vector.broadcast %21 : vector<16x1xf32> to vector<16x128xf32>
    %47 = arith.mulf %46, %45 : vector<16x128xf32>
    %c0_24 = arith.constant 0 : index
    %c0_25 = arith.constant 0 : index
    %48 = vector.load %arg5[%c0_24, %c0_25] : memref<1x128xf32, #tpu.memory_space<vmem>>, vector<1x128xf32>
    %49 = vector.broadcast %48 : vector<1x128xf32> to vector<16x128xf32>
    %50 = arith.addf %47, %49 : vector<16x128xf32>
    %cst_26 = arith.constant 5.000000e-01 : f32
    %51 = vector.broadcast %cst_26 : f32 to vector<16x128xf32>
    %52 = arith.mulf %51, %50 : vector<16x128xf32>
    %cst_27 = arith.constant 0.707106769 : f32
    %53 = vector.broadcast %cst_27 : f32 to vector<16x128xf32>
    %54 = arith.mulf %50, %53 : vector<16x128xf32>
    %55 = math.erf %54 : vector<16x128xf32>
    %cst_28 = arith.constant 1.000000e+00 : f32
    %56 = vector.broadcast %cst_28 : f32 to vector<16x128xf32>
    %57 = arith.addf %56, %55 : vector<16x128xf32>
    %58 = arith.mulf %52, %57 : vector<16x128xf32>
    %c0_29 = arith.constant 0 : index
    %c0_30 = arith.constant 0 : index
    %59 = vector.load %arg6[%c0_29, %c0_30] : memref<128x32xf32, #tpu.memory_space<vmem>>, vector<128x32xf32>
    %cst_31 = arith.constant dense<0.000000e+00> : vector<16x32xf32>
    %60 = tpu.matmul %58, %59, %cst_31 {dimension_numbers = #tpu.dot_dimension_numbers<[1], [0], [0], [1], [0, 0, 1, 1], [], []>} : vector<16x128xf32>, vector<128x32xf32>, vector<16x32xf32> -> vector<16x32xf32>
    %c0_32 = arith.constant 0 : index
    %c0_33 = arith.constant 0 : index
    %61 = vector.load %arg7[%c0_32, %c0_33] : memref<1x32xf32, #tpu.memory_space<vmem>>, vector<1x32xf32>
    %62 = vector.broadcast %61 : vector<1x32xf32> to vector<16x32xf32>
    %63 = arith.addf %60, %62 : vector<16x32xf32>
    %64 = arith.addf %23, %63 : vector<16x32xf32>
    %c0_34 = arith.constant 0 : index
    %c0_35 = arith.constant 0 : index
    %65 = vector.load %arg10[%c0_34, %c0_35] : memref<16x32xf32, #tpu.memory_space<vmem>>, vector<16x32xf32>
    tpu.vector_store %arg10[%c0_34, %c0_35], %64 {strides = array<i32>} : memref<16x32xf32, #tpu.memory_space<vmem>>, vector<16x32xf32>,
    %c0_i32_36 = arith.constant 0 : i32
    %c16_i32_37 = arith.constant 16 : i32
    %66 = arith.addi %c0_i32_36, %c16_i32_37 : i32
    %c1_i32_38 = arith.constant 1 : i32
    scf.for %arg13 = %c0_i32_36 to %66 step %c1_i32_38  : i32 {
      %c1_i32_44 = arith.constant 1 : i32
      %68 = arith.muli %arg13, %c1_i32_44 : i32
      %c0_i32_45 = arith.constant 0 : i32
      %69 = arith.addi %c0_i32_45, %68 : i32
      %70 = arith.index_cast %69 : i32 to index
      %71 = memref.load %arg0[%70] : memref<16xi32, #tpu.memory_space<smem>>
      %c8_i32 = arith.constant 8 : i32
      %c0_i32_46 = arith.constant 0 : i32
      %72 = arith.cmpi eq, %c8_i32, %c0_i32_46 : i32
      %c1_i32_47 = arith.constant 1 : i32
      %73 = arith.select %72, %c1_i32_47, %c8_i32 : i32
      %74 = arith.remsi %69, %73 : i32
      %c0_i32_48 = arith.constant 0 : i32
      %75 = arith.cmpi ne, %74, %c0_i32_48 : i32
      %c0_i32_49 = arith.constant 0 : i32
      %76 = arith.cmpi slt, %74, %c0_i32_49 : i32
      %c0_i32_50 = arith.constant 0 : i32
      %77 = arith.cmpi slt, %73, %c0_i32_50 : i32
      %78 = arith.xori %76, %77 : i1
      %79 = arith.andi %78, %75 : i1
      %80 = arith.addi %74, %73 : i32
      %81 = arith.select %79, %80, %74 : i32
      %c0_i32_51 = arith.constant 0 : i32
      %82 = tpu.memref_slice %arg10[%69, %c0_i32_51] : memref<16x32xf32, #tpu.memory_space<vmem>> -> memref<1x32xf32, #tpu.memory_space<vmem>>
      %c0_i32_52 = arith.constant 0 : i32
      %83 = tpu.memref_slice %arg8[%71, %c0_i32_52] : memref<32x32xf32, #tpu.memory_space<any>> -> memref<1x32xf32, #tpu.memory_space<any>>
      %84 = tpu.memref_slice %arg12[%81] : memref<8x!tpu.dma_semaphore, #tpu.memory_space<semaphore_mem>> -> memref<1x!tpu.dma_semaphore, #tpu.memory_space<semaphore_mem>>
      %85 = tpu.memref_squeeze %84 : memref<1x!tpu.dma_semaphore, #tpu.memory_space<semaphore_mem>> -> memref<!tpu.dma_semaphore, #tpu.memory_space<semaphore_mem>>
      tpu.enqueue_dma source(%82 : memref<1x32xf32, #tpu.memory_space<vmem>>) target(%83 : memref<1x32xf32, #tpu.memory_space<any>>) target_semaphore(%85 : memref<!tpu.dma_semaphore, #tpu.memory_space<semaphore_mem>>)
    }
    %c16_i32_39 = arith.constant 16 : i32
    %c0_i32_40 = arith.constant 0 : i32
    %c16_i32_41 = arith.constant 16 : i32
    %67 = arith.addi %c0_i32_40, %c16_i32_41 : i32
    %c1_i32_42 = arith.constant 1 : i32
    scf.for %arg13 = %c0_i32_40 to %67 step %c1_i32_42  : i32 {
      %c1_i32_44 = arith.constant 1 : i32
      %68 = arith.muli %arg13, %c1_i32_44 : i32
      %c0_i32_45 = arith.constant 0 : i32
      %69 = arith.addi %c0_i32_45, %68 : i32
      %c8_i32 = arith.constant 8 : i32
      %c0_i32_46 = arith.constant 0 : i32
      %70 = arith.cmpi eq, %c8_i32, %c0_i32_46 : i32
      %c1_i32_47 = arith.constant 1 : i32
      %71 = arith.select %70, %c1_i32_47, %c8_i32 : i32
      %72 = arith.remsi %69, %71 : i32
      %c0_i32_48 = arith.constant 0 : i32
      %73 = arith.cmpi ne, %72, %c0_i32_48 : i32
      %c0_i32_49 = arith.constant 0 : i32
      %74 = arith.cmpi slt, %72, %c0_i32_49 : i32
      %c0_i32_50 = arith.constant 0 : i32
      %75 = arith.cmpi slt, %71, %c0_i32_50 : i32
      %76 = arith.xori %74, %75 : i1
      %77 = arith.andi %76, %73 : i1
      %78 = arith.addi %72, %71 : i32
      %79 = arith.select %77, %78, %72 : i32
      %c0_i32_51 = arith.constant 0 : i32
      %c0_i32_52 = arith.constant 0 : i32
      %80 = tpu.memref_slice %arg10[%c0_i32_51, %c0_i32_52] : memref<16x32xf32, #tpu.memory_space<vmem>> -> memref<1x32xf32, #tpu.memory_space<vmem>>
      %c0_i32_53 = arith.constant 0 : i32
      %c0_i32_54 = arith.constant 0 : i32
      %81 = tpu.memref_slice %arg8[%c0_i32_53, %c0_i32_54] : memref<32x32xf32, #tpu.memory_space<any>> -> memref<1x32xf32, #tpu.memory_space<any>>
      %82 = tpu.memref_slice %arg12[%79] : memref<8x!tpu.dma_semaphore, #tpu.memory_space<semaphore_mem>> -> memref<1x!tpu.dma_semaphore, #tpu.memory_space<semaphore_mem>>
      %83 = tpu.memref_squeeze %82 : memref<1x!tpu.dma_semaphore, #tpu.memory_space<semaphore_mem>> -> memref<!tpu.dma_semaphore, #tpu.memory_space<semaphore_mem>>
      tpu.wait_dma2 semaphore(%83 : memref<!tpu.dma_semaphore, #tpu.memory_space<semaphore_mem>>) src(%80 : memref<1x32xf32, #tpu.memory_space<vmem>>) dst(%81 : memref<1x32xf32, #tpu.memory_space<any>>)
    }
    %c16_i32_43 = arith.constant 16 : i32
    return
  }
}

</mosaic_0001>

<bundles_post_ra>
// kernel: graph_conv_adapter_forward.1
= control target key start
LH: loop header
LB: loop body
LE: loop exit
PB: predicated region body
PF: predicated region fallthrough
CT: control target
= control target key end

     0   :  { %13 = vsyncpa [#allocation7], 0  ;;  %s1001_s30 = smov [#allocation6]   ;;  %s1278_s0 = inlined_call_operand.vmem [shape: s32[16], index: 0, kind: input, shape index: {}]   ;;  %s1279_s1 = inlined_call_operand.vmem [shape: s32[128,1], index: 1, kind: input, shape index: {}]   ;;  %s1280_s2 = inlined_call_operand.vmem [shape: s32[1,128], index: 2, kind: input, shape index: {}]   ;;  %s1281_s3 = inlined_call_operand.vmem [shape: f32[32,32], index: 3, kind: input, shape index: {}, may-alias: {3,8}]   ;;  %s1282_s4 = inlined_call_operand.vmem [shape: f32[32,128], index: 4, kind: input, shape index: {}]   ;;  %s1283_s5 = inlined_call_operand.vmem [shape: f32[1,128], index: 5, kind: input, shape index: {}]   ;;  %s1284_s6 = inlined_call_operand.vmem [shape: f32[128,32], index: 6, kind: input, shape index: {}]   ;;  %s1285_s7 = inlined_call_operand.vmem [shape: f32[1,32], index: 7, kind: input, shape index: {}]   ;;  %s1286_s8 = inlined_call_operand.vmem [shape: f32[32,32], index: 8, kind: output, shape index: {}, may-alias: {3,8}]  }
   0x1   :  { %s19_s29 = sshll.u32 %s1278_s0, 4  ;;  %s20_s29 = int_to_ptr.vmem [resolvable:$true] %s19_s29 }
   0x2   :  { %22 = dma.vmem_to_smem %s20_s29, 16, %s1001_s30, [#allocation7]  }
   0x3   :  { %979 = dma.done.wait [#allocation7], 16  }
   0x4   :  { %980 = vsyncadd [#allocation7], 4294967280 }
   0x5   :  { %39 = sfence }
   0x6   :  { %s985_s9 = smov 0  }
   0x7 LB: > { %s46_s10 = sld [smem:[#allocation6 + %s987_s9]]  ;;  %p47_p0 = scmp.lt.s32.totalorder %s987_s9, 0  ;;  %s987_s9 = sphi %s985_s9, %s45_s9  }
   0x8   : > { %s48_s11 = ssub.s32 0, %s987_s9  ;;  %s60_s18 = scalar_lea.vmem [#allocation2], %s987_s9 }
   0x9   : > { %s826_s12 = smin.u32 %s987_s9, %s48_s11 }
   0xa   : > { %s50_s13 = sand.u32 7, %s826_s12  }
   0xb   : > { %s51_s14 = ssub.s32 0, %s50_s13 }
   0xc   : > { %s1288_s14 = smov (!%p47_p0, %s51_s14), %s50_s13 }
   0xd   : > { %s59_s0 = scalar_lea.vmem %s1281_s3, %s46_s10  ;;  %p828_p1 = scmp.lt.s32.totalorder %s1288_s14, 0 }
   0xe   : > { %s57_s17 = sadd.s32 8, %s1288_s14  ;;  %v76_v0 = vld [vmem:[%s59_s0] sm:$0x1] }
   0xf   : > { %77 = vst [vmem:[%s60_s18] sm:$0x1] %v76_v0  ;;  %s1290_s17 = smov (!%p828_p1, %s57_s17), %s1288_s14 }
  0x10   : > { %s61_s19 = scalar_lea.sflag [#allocation4], %s1290_s17 }
  0x11   : > { %95 = vsyncadd %s61_s19, 16  ;;  %s45_s9 = sadd.s32 1, %s987_s9  }
  0x12   : > { %p42_p2 = scmp.ge.s32.totalorder %s45_s9, 16  }
  0x13   :  { %v96_v1 = vlaneseq (%p42_p2)  ;;  %v936_v2 = vld [vmem:[%s1280_s2] ss:$0 sm:$0xff] (%p42_p2)  ;;  %v1002_v6 = vmov (%p42_p2), 0.0   ;;  %s989_s3 = smov (%p42_p2), 0  }
  0x14   :  { %44 = sbr.rel (!%p42_p2) target bundleno = 7 (0x7), region = 162 }
  0x15   :  { %v1059_v3 = vshrl.u32 (%p42_p2), %v96_v1, 7  ;;  %v1061_v4 = vand.u32 (%p42_p2), 127, %v96_v1 }
  0x17   :  { %vm103_vm0 = vcmp.eq.s32.totalorder (%p42_p2), %v936_v2, %v1059_v3  ;;  %v1065_v5 = vadd.s32 (%p42_p2), 8, %v1059_v3 }
  0x18   :  { %v829_v7 = vsel (%p42_p2), %vm103_vm0, 1.0, %v1002_v6 }
  0x19   :  { %109 = vadd.xlane.f32.xlu0 %v829_v7  ;;  %vm104_vm1 = vcmp.eq.s32.totalorder %v936_v2, %v1065_v5 }
  0x1a   :  { %v830_v8 = vsel %vm104_vm1, 1.0, %v1002_v6 }
  0x21   :  { %111 = vadd.xlane.f32.xlu0 %v830_v8 }
  0x8c   :  { %v110_v9 = vpop.xlane.xlu0 %109 }
  0x8d   :  { %v117_v10 = vmax.f32 %v110_v9, 1.0  ;;  %vm115_vm5 = vcmp.gt.f32.partialorder %v110_v9, 0.0 }
  0x8f   :  { %937 = vrsqrt.f32 %v117_v10  ;;  %vm125_vm3 = vweird.f32 %v117_v10 }
  0x94   :  { %v112_v11 = vpop.xlane.xlu0 %111 }
  0x95   :  { %v938_v12 = vpop.eup %937  ;;  %v118_v13 = vmax.f32 %v112_v11, 1.0  ;;  %vm116_vm9 = vcmp.gt.f32.partialorder %v112_v11, 0.0 }
  0x96   :  { %v120_v14 = vmul.f32 %v938_v12, %v117_v10  ;;  %vm126_vm2 = vweird.f32 %v938_v12 }
  0x97   :  { %939 = vrsqrt.f32 %v118_v13  ;;  %vm127_vm4 = vmor %vm125_vm3, %vm126_vm2  ;;  %vm135_vm7 = vweird.f32 %v118_v13 }
  0x98   :  { %v121_v15 = vmul.f32 %v938_v12, %v120_v14 }
  0x9a   :  { %v122_v16 = vmul.f32 0.5, %v121_v15 }
  0x9c   :  { %v123_v17 = vsub.f32 1.5, %v122_v16 }
  0x9d   :  { %v940_v18 = vpop.eup %939 }
  0x9e   :  { %v124_v19 = vmul.f32 %v938_v12, %v123_v17  ;;  %v130_v20 = vmul.f32 %v940_v18, %v118_v13  ;;  %vm136_vm6 = vweird.f32 %v940_v18 }
  0x9f   :  { %vm137_vm8 = vmor %vm135_vm7, %vm136_vm6 }
  0xa0   :  { %v128_v21 = vsel %vm127_vm4, %v938_v12, %v124_v19  ;;  %v131_v22 = vmul.f32 %v940_v18, %v130_v20 }
  0xa1   :  { %v1070_v23 = vsel %vm115_vm5, %v128_v21, 0.0 }
  0xa2   :  { %v132_v24 = vmul.f32 0.5, %v131_v22 }
  0xa4   :  { %v133_v25 = vsub.f32 1.5, %v132_v24 }
  0xa6   :  { %v134_v26 = vmul.f32 %v940_v18, %v133_v25 }
  0xa8   :  { %v138_v27 = vsel %vm137_vm8, %v940_v18, %v134_v26 }
  0xa9   :  { %v1072_v28 = vsel %vm116_vm9, %v138_v27, 0.0 }
  0xaa LB: > { %p147_p3 = scmp.lt.s32.totalorder %s991_s3, 0  ;;  %s148_s22 = ssub.s32 0, %s991_s3  ;;  %s991_s3 = sphi %s989_s3, %s146_s3  }
  0xab   : > { %s831_s23 = smin.u32 %s991_s3, %s148_s22 }
  0xac   : > { %s150_s24 = sand.u32 7, %s831_s23  }
  0xad   : > { %s151_s25 = ssub.s32 0, %s150_s24 }
  0xae   : > { %s1292_s25 = smov (!%p147_p3, %s151_s25), %s150_s24 }
  0xaf   : > { %p833_p4 = scmp.lt.s32.totalorder %s1292_s25, 0  ;;  %s157_s26 = sadd.s32 8, %s1292_s25 }
  0xb1   : > { %s1294_s26 = smov (!%p833_p4, %s157_s26), %s1292_s25 }
  0xb2   : > { %s159_s27 = scalar_lea.sflag [#allocation4], %s1294_s26 }
  0xb3   : > { %981 = dma.done.wait %s159_s27, 16 }
  0xb4   : > { %982 = vsyncadd %s159_s27, 4294967280  ;;  %s146_s3 = sadd.s32 1, %s991_s3  }
  0xb5   : > { %p143_p5 = scmp.ge.s32.totalorder %s146_s3, 16  }
  0xb6   :  { %v168_v29 = vld [vmem:[%s1282_s4 + $0x18] sm:$0xff] (%p143_p5)  ;;  %v205_v30 = vld [vmem:[%s1279_s1 + $0x20] sm:$0xff] (%p143_p5)  ;;  %v167_v31 = vld [vmem:[%s1282_s4 + $0x10] sm:$0xff] (%p143_p5)  ;;  %v1003_v32 = vmov (%p143_p5), 0   ;;  %vm169_vm10 = vcmask (%p143_p5), 261120   ;;  %vm313_vm14 = vcmask (%p143_p5), 130048  }
  0xb7   :  { %145 = sbr.rel (!%p143_p5) target bundleno = 170 (0xaa), region = 173  ;;  %941 = vset.pattern.permute.xlu0 (%p143_p5), %v1003_v32  ;;  %188 = vmatpush.msra.mxu0 (%p143_p5), %v168_v29  ;;  %v207_v33 = vld [vmem:[%s1279_s1 + $0x30] sm:$0xff] (%p143_p5)  ;;  %v166_v34 = vld [vmem:[%s1282_s4 + $0x8] sm:$0xff] (%p143_p5)  ;;  %v165_v35 = vld [vmem:[%s1282_s4] sm:$0xff] (%p143_p5)  ;;  %s993_s25 = smov (%p143_p5), 0  }
  0xb8   :  { %230 = vperm.xlu0 (%p143_p5), %941, %v205_v30   ;;  %942 = vset.pattern.permute.xlu1 (%p143_p5), %v1003_v32  ;;  %v1092_v36 = vld [vmem:[#allocation2] sm:$0xff] (%p143_p5)  ;;  %v208_v37 = vld [vmem:[%s1279_s1 + $0x38] sm:$0xff] (%p143_p5)  ;;  %v206_v38 = vld [vmem:[%s1279_s1 + $0x28] sm:$0xff] (%p143_p5) }
  0xb9   :  { %189 = vmatpush.msra.mxu0 (%p143_p5), %v167_v31  ;;  %236 = vperm.xlu1 (%p143_p5), %942, %v207_v33   ;;  %v213_v39 = vld [vmem:[%s1279_s1 + $0x60] sm:$0xff] (%p143_p5)  ;;  %v214_v40 = vld [vmem:[%s1279_s1 + $0x68] sm:$0xff] (%p143_p5)  ;;  %v215_v43 = vld [vmem:[%s1279_s1 + $0x70] sm:$0xff] (%p143_p5) }
  0xba   :  { %943 = vset.pattern.permute.xlu2 (%p143_p5), %v1003_v32  ;;  %v1108_v41 = vld [vmem:[#allocation2 + $0x8] sm:$0xff] (%p143_p5)  ;;  %v209_v42 = vld [vmem:[%s1279_s1 + $0x40] sm:$0xff] (%p143_p5)  ;;  %v216_v45 = vld [vmem:[%s1279_s1 + $0x78] sm:$0xff] (%p143_p5) }
  0xbb   :  { %190 = vmatpush.msra.mxu0 (%p143_p5), %v166_v34  ;;  %239 = vperm.xlu2 (%p143_p5), %943, %v208_v37   ;;  %v210_v44 = vld [vmem:[%s1279_s1 + $0x48] sm:$0xff] (%p143_p5)  ;;  %v201_v46 = vld [vmem:[%s1279_s1] sm:$0xff] (%p143_p5)  ;;  %v211_v47 = vld [vmem:[%s1279_s1 + $0x50] sm:$0xff] (%p143_p5) }
  0xbc   :  { %v202_v48 = vld [vmem:[%s1279_s1 + $0x8] sm:$0xff]  ;;  %v212_v49 = vld [vmem:[%s1279_s1 + $0x58] sm:$0xff]  ;;  %v203_v50 = vld [vmem:[%s1279_s1 + $0x10] sm:$0xff] }
  0xbd   :  { %191 = vmatpush.msra.mxu0 %v165_v35  ;;  %v204_v51 = vld [vmem:[%s1279_s1 + $0x18] sm:$0xff] }
  0xbe   :  { %834 = vmatmul.msk.f32.vlgmr.msra.gmra.mxu0 %vm169_vm10, %v1092_v36 }
  0xc0   :  { %233 = vperm.xlu0 %941, %v206_v38  }
  0xc1   :  { %254 = vperm.xlu1 %942, %v213_v39  }
  0xc3   :  { %257 = vperm.xlu2 %943, %v214_v40  }
  0xc6   :  { %835 = vmatmul.msk.f32.gmra.mxu0 %vm169_vm10, %v1108_v41 }
  0xc8   :  { %242 = vperm.xlu0 %941, %v209_v42  }
  0xc9   :  { %260 = vperm.xlu1 %942, %v215_v43  }
  0xcb   :  { %245 = vperm.xlu2 %943, %v210_v44  }
  0xd0   :  { %263 = vperm.xlu0 %941, %v216_v45  }
  0xd1   :  { %218 = vperm.xlu1 %942, %v201_v46   ;;  %v944_v46 = vld [vmem:[%s1280_s2] ss:$0 sm:$0xff] }
  0xd3   :  { %248 = vperm.xlu2 %943, %v211_v47   ;;  %v1004_v47 = vmov 1.0  }
  0xd8   :  { %221 = vperm.xlu0 %941, %v202_v48   ;;  %v569_v48 = vld [vmem:[%s1284_s6 + $0x78] sm:$0xff] }
  0xd9   :  { %251 = vperm.xlu1 %942, %v212_v49   ;;  %574 = vmatpush.msra.mxu3 %v569_v48  ;;  %v568_v49 = vld [vmem:[%s1284_s6 + $0x70] sm:$0xff] }
  0xdb   :  { %224 = vperm.xlu2 %943, %v203_v50   ;;  %575 = vmatpush.msra.mxu3 %v568_v49  ;;  %v945_v50 = vld [vmem:[%s1283_s5] ss:$0 sm:$0xff] }
  0xe0   :  { %227 = vperm.xlu0 %941, %v204_v51  }
 0x115   :  { %v240_v52 = vpop.permute.xlu2 %239 }
 0x116   :  { %vm272_vm6 = vcmp.eq.s32.totalorder %v240_v52, %v1061_v4  ;;  %v565_v52 = vld [vmem:[%s1284_s6 + $0x58] sm:$0xff] }
 0x117   :  { %v843_v21 = vsel %vm272_vm6, 1.0, %v1002_v6 }
 0x11d   :  { %v258_v56 = vpop.permute.xlu2 %257 }
 0x11e   :  { %vm278_vm15 = vcmp.eq.s32.totalorder %v258_v56, %v1061_v4  ;;  %v563_v56 = vld [vmem:[%s1284_s6 + $0x48] sm:$0xff] }
 0x11f   :  { %v849_v12 = vsel %vm278_vm15, 1.0, %v1002_v6 }
 0x125   :  { %v246_v61 = vpop.permute.xlu2 %245 }
 0x126   :  { %vm274_vm9 = vcmp.eq.s32.totalorder %v246_v61, %v1061_v4  ;;  %v560_v61 = vld [vmem:[%s1284_s6 + $0x30] sm:$0xff] }
 0x127   :  { %v845_v25 = vsel %vm274_vm9, 1.0, %v1002_v6 }
 0x12a   :  { %v231_v53 = vpop.permute.xlu0 %230 }
 0x12b   :  { %v237_v54 = vpop.permute.xlu1 %236  ;;  %vm269_vm11 = vcmp.eq.s32.totalorder %v231_v53, %v1061_v4 }
 0x12c   :  { %v840_v9 = vsel %vm269_vm11, 1.0, %v1002_v6  ;;  %vm271_vm3 = vcmp.eq.s32.totalorder %v237_v54, %v1061_v4  ;;  %v564_v54 = vld [vmem:[%s1284_s6 + $0x50] sm:$0xff] }
 0x12d   :  { %v249_v8 = vpop.permute.xlu2 %248  ;;  %v842_v17 = vsel %vm271_vm3, 1.0, %v1002_v6 }
 0x12e   :  { %vm275_vm11 = vcmp.eq.s32.totalorder %v249_v8, %v1061_v4  ;;  %v558_v8 = vld [vmem:[%s1284_s6 + $0x20] sm:$0xff] }
 0x12f   :  { %v846_v26 = vsel %vm275_vm11, 1.0, %v1002_v6 }
 0x132   :  { %v234_v55 = vpop.permute.xlu0 %233 }
 0x133   :  { %v255_v57 = vpop.permute.xlu1 %254  ;;  %vm270_vm1 = vcmp.eq.s32.totalorder %v234_v55, %v1061_v4 }
 0x134   :  { %vm277_vm12 = vcmp.eq.s32.totalorder %v255_v57, %v1061_v4  ;;  %v841_v15 = vsel %vm270_vm1, 1.0, %v1002_v6 }
 0x135   :  { %v848_v10 = vsel %vm277_vm12, 1.0, %v1002_v6  ;;  %v225_v14 = vpop.permute.xlu2 %224 }
 0x136   :  { %vm267_vm2 = vcmp.eq.s32.totalorder %v225_v14, %v1061_v4 }
 0x137   :  { %v838_v16 = vsel %vm267_vm2, 1.0, %v1002_v6 }
 0x13a   :  { %v243_v58 = vpop.permute.xlu0 %242 }
 0x13b   :  { %v193_v59 = vpop.f32.mrf.mxu0  ;;  %v261_v60 = vpop.permute.xlu1 %260  ;;  %vm273_vm8 = vcmp.eq.s32.totalorder %v243_v58, %v1061_v4 }
 0x13c   :  { %v199_v2 = vmul.f32 %v193_v59, %v1070_v23  ;;  %vm279_vm4 = vcmp.eq.s32.totalorder %v261_v60, %v1061_v4  ;;  %v844_v24 = vsel %vm273_vm8, 1.0, %v1002_v6  ;;  %v561_v59 = vld [vmem:[%s1284_s6 + $0x38] sm:$0xff] }
 0x13d   :  { %v850_v18 = vsel %vm279_vm4, 1.0, %v1002_v6 }
 0x142   :  { %v264_v62 = vpop.permute.xlu0 %263 }
 0x143   :  { %v196_v63 = vpop.f32.mrf.mxu0  ;;  %v219_v0 = vpop.permute.xlu1 %218  ;;  %vm280_vm7 = vcmp.eq.s32.totalorder %v264_v62, %v1061_v4 }
 0x144   :  { %v200_v1 = vmul.f32 %v196_v63, %v1072_v28  ;;  %vm265_vm13 = vcmp.eq.s32.totalorder %v219_v0, %v1061_v4  ;;  %v851_v22 = vsel %vm280_vm7, 1.0, %v1002_v6  ;;  %v559_v0 = vld [vmem:[%s1284_s6 + $0x28] sm:$0xff] }
 0x145   :  { %v836_v7 = vsel %vm265_vm13, 1.0, %v1002_v6  ;;  %vm429_vm13 = vcmp.eq.s32.totalorder %v944_v46, %v1059_v3  ;;  %v567_v3 = vld [vmem:[%s1284_s6 + $0x68] sm:$0xff] }
 0x146   :  { %376 = vmatpush.msrb.mxu0 %v200_v1  ;;  %896 = vmatpush.msra.mxu1 %v200_v1 }
 0x147   :  { %897 = vmatpush.msra.mxu2 %v200_v1  ;;  %576 = vmatpush.msra.mxu3 %v567_v3 }
 0x148   :  { %377 = vmatpush.msrb.mxu0 %v199_v2  ;;  %898 = vmatpush.msra.mxu1 %v199_v2 }
 0x149   :  { %899 = vmatpush.msra.mxu2 %v199_v2  ;;  %852 = vmatmul.msk.f32.vlgmr.msrb.gmra.mxu0 %vm313_vm14, %v836_v7 }
 0x14a   :  { %856 = vmatmul.msk.f32.vlgmr.msra.gmra.mxu1 %vm313_vm14, %v840_v9  ;;  %864 = vmatmul.msk.f32.vlgmr.msra.gmra.mxu2 %vm313_vm14, %v848_v10  ;;  %v222_v11 = vpop.permute.xlu0 %221 }
 0x14b   :  { %vm266_vm0 = vcmp.eq.s32.totalorder %v222_v11, %v1061_v4  ;;  %v252_v27 = vpop.permute.xlu1 %251  ;;  %v557_v11 = vld [vmem:[%s1284_s6 + $0x18] sm:$0xff] }
 0x14c   :  { %v837_v13 = vsel %vm266_vm0, 1.0, %v1002_v6  ;;  %vm276_vm12 = vcmp.eq.s32.totalorder %v252_v27, %v1061_v4 }
 0x14d   :  { %v847_v29 = vsel %vm276_vm12, 1.0, %v1002_v6 }
 0x151   :  { %853 = vmatmul.msk.f32.gmra.mxu0 %vm313_vm14, %v837_v13 }
 0x152   :  { %857 = vmatmul.msk.f32.gmra.mxu1 %vm313_vm14, %v841_v15  ;;  %865 = vmatmul.msk.f32.gmra.mxu2 %vm313_vm14, %v849_v12  ;;  %v228_v19 = vpop.permute.xlu0 %227  ;;  %v556_v15 = vld [vmem:[%s1284_s6 + $0x10] sm:$0xff] }
 0x153   :  { %vm268_vm5 = vcmp.eq.s32.totalorder %v228_v19, %v1061_v4 }
 0x154   :  { %v839_v20 = vsel %vm268_vm5, 1.0, %v1002_v6 }
 0x159   :  { %854 = vmatmul.msk.f32.gmra.mxu0 %vm313_vm14, %v838_v16 }
 0x15a   :  { %858 = vmatmul.msk.f32.gmra.mxu1 %vm313_vm14, %v842_v17  ;;  %866 = vmatmul.msk.f32.gmra.mxu2 %vm313_vm14, %v850_v18  ;;  %v555_v18 = vld [vmem:[%s1284_s6 + $0x8] sm:$0xff] }
 0x161   :  { %855 = vmatmul.msk.f32.gmra.mxu0 %vm313_vm14, %v839_v20 }
 0x162   :  { %859 = vmatmul.msk.f32.gmra.mxu1 %vm313_vm14, %v843_v21  ;;  %867 = vmatmul.msk.f32.gmra.mxu2 %vm313_vm14, %v851_v22 }
 0x16a   :  { %860 = vmatmul.msk.f32.gmra.mxu1 %vm313_vm14, %v844_v24  ;;  %v554_v24 = vld [vmem:[%s1284_s6] sm:$0xff] }
 0x172   :  { %861 = vmatmul.msk.f32.gmra.mxu1 %vm313_vm14, %v845_v25 }
 0x17a   :  { %862 = vmatmul.msk.f32.gmra.mxu1 %vm313_vm14, %v846_v26 }
 0x182   :  { %863 = vmatmul.msk.f32.gmra.mxu1 %vm313_vm14, %v847_v29  ;;  %vm430_vm14 = vcmp.eq.s32.totalorder %v944_v46, %v1065_v5  ;;  %v566_v5 = vld [vmem:[%s1284_s6 + $0x60] sm:$0xff] }
 0x183   :  { %577 = vmatpush.msra.mxu3 %v566_v5 }
 0x185   :  { %578 = vmatpush.msra.mxu3 %v565_v52 }
 0x187   :  { %579 = vmatpush.msra.mxu3 %v564_v54 }
 0x189   :  { %580 = vmatpush.msra.mxu3 %v563_v56 }
 0x1c6   :  { %v379_v42 = vpop.f32.mrf.mxu0 }
 0x1c7   :  { %v391_v30 = vpop.f32.mrf.mxu1 }
 0x1cd   :  { %v415_v31 = vpop.f32.mrf.mxu2 }
 0x1ce   :  { %v382_v43 = vpop.f32.mrf.mxu0 }
 0x1cf   :  { %v394_v32 = vpop.f32.mrf.mxu1 }
 0x1d5   :  { %v418_v33 = vpop.f32.mrf.mxu2 }
 0x1d6   :  { %v385_v44 = vpop.f32.mrf.mxu0 }
 0x1d7   :  { %v397_v34 = vpop.f32.mrf.mxu1 }
 0x1dd   :  { %v421_v35 = vpop.f32.mrf.mxu2 }
 0x1de   :  { %v388_v45 = vpop.f32.mrf.mxu0 }
 0x1df   :  { %v400_v37 = vpop.f32.mrf.mxu1 }
 0x1e5   :  { %v424_v38 = vpop.f32.mrf.mxu2 }
 0x1e6   :  { %435 = vmatpush.msrb.mxu2 %v424_v38 }
 0x1e7   :  { %v403_v39 = vpop.f32.mrf.mxu1 }
 0x1e8   :  { %436 = vmatpush.msrb.mxu2 %v421_v35 }
 0x1ea   :  { %437 = vmatpush.msrb.mxu2 %v418_v33 }
 0x1ec   :  { %438 = vmatpush.msrb.mxu2 %v415_v31 }
 0x1ef   :  { %v406_v40 = vpop.f32.mrf.mxu1 }
 0x1f7   :  { %v409_v4 = vpop.f32.mrf.mxu1 }
 0x1ff   :  { %v412_v6 = vpop.f32.mrf.mxu1 }
 0x200   :  { %439 = vmatpush.msrb.mxu2 %v412_v6 }
 0x202   :  { %440 = vmatpush.msrb.mxu2 %v409_v4 }
 0x204   :  { %441 = vmatpush.msrb.mxu2 %v406_v40 }
 0x206   :  { %442 = vmatpush.msrb.mxu2 %v403_v39 }
 0x208   :  { %443 = vmatpush.msrb.mxu2 %v400_v37 }
 0x20a   :  { %444 = vmatpush.msrb.mxu2 %v397_v34 }
 0x20c   :  { %445 = vmatpush.msrb.mxu2 %v394_v32 }
 0x20e   :  { %446 = vmatpush.msrb.mxu2 %v391_v30 }
 0x210   :  { %447 = vmatpush.msrb.mxu2 %v388_v45 }
 0x212   :  { %448 = vmatpush.msrb.mxu2 %v385_v44 }
 0x214   :  { %449 = vmatpush.msrb.mxu2 %v382_v43 }
 0x216   :  { %450 = vmatpush.msrb.mxu2 %v379_v42 }
 0x217   :  { %870 = vmatmul.msk.f32.vlgmr.msrb.gmra.mxu2 %vm429_vm13, %v1004_v47 }
 0x21f   :  { %871 = vmatmul.msk.f32.gmra.mxu2 %vm430_vm14, %v1004_v47 }
 0x29a   :  { %v452_v51 = vpop.f32.mrf.mxu2 }
 0x29b   :  { %v458_v53 = vmul.f32 %v452_v51, %v1070_v23  ;;  %v562_v23 = vld [vmem:[%s1284_s6 + $0x40] sm:$0xff] }
 0x29c   :  { %581 = vmatpush.msra.mxu3 %v562_v23 }
 0x29d   :  { %v1219_v55 = vadd.f32 %v945_v50, %v458_v53 }
 0x29e   :  { %582 = vmatpush.msra.mxu3 %v561_v59 }
 0x29f   :  { %v1225_v57 = vmul.f32 0.70710677, %v1219_v55 }
 0x2a0   :  { %583 = vmatpush.msra.mxu3 %v560_v61 }
 0x2a1   :  { %v470_v58 = vmul.f32 %v1225_v57, %v1225_v57 }
 0x2a2   :  { %v455_v60 = vpop.f32.mrf.mxu2  ;;  %584 = vmatpush.msra.mxu3 %v559_v0 }
 0x2a3   :  { %v471_v62 = vmin.f32 %v470_v58, 16.0  ;;  %v459_v63 = vmul.f32 %v455_v60, %v1072_v28 }
 0x2a4   :  { %585 = vmatpush.msra.mxu3 %v558_v8 }
 0x2a5   :  { %v1242_v1 = vadd.f32 %v945_v50, %v459_v63  ;;  %v472_v2 = vmul.f32 2.1237322e-06, %v471_v62  ;;  %v483_v7 = vmul.f32 3.8918573e-05, %v471_v62 }
 0x2a6   :  { %586 = vmatpush.msra.mxu3 %v557_v11 }
 0x2a7   :  { %v1248_v9 = vmul.f32 0.70710677, %v1242_v1  ;;  %v473_v10 = vadd.f32 0.00028619796, %v472_v2  ;;  %v484_v28 = vadd.f32 0.001143296, %v483_v7 }
 0x2a8   :  { %587 = vmatpush.msra.mxu3 %v556_v15 }
 0x2a9   :  { %v510_v12 = vmul.f32 %v1248_v9, %v1248_v9  ;;  %v474_v13 = vmul.f32 %v473_v10, %v471_v62  ;;  %v485_v14 = vmul.f32 %v484_v28, %v471_v62 }
 0x2aa   :  { %588 = vmatpush.msra.mxu3 %v555_v18 }
 0x2ab   :  { %v511_v16 = vmin.f32 %v510_v12, 16.0  ;;  %v486_v17 = vadd.f32 0.014752088, %v485_v14  ;;  %v475_v19 = vadd.f32 0.0036580483, %v474_v13  ;;  %v466_v14 = vmul.f32 0.5, %v1219_v55 }
 0x2ac   :  { %589 = vmatpush.msra.mxu3 %v554_v24  ;;  %v467_v24 = vmul.f32 0.5, %v1242_v1  ;;  %v946_v55 = vld [vmem:[%s1285_s7] ss:$0 sm:$0xff] }
 0x2ad   :  { %v512_v20 = vmul.f32 2.1237322e-06, %v511_v16  ;;  %v487_v21 = vmul.f32 %v486_v17, %v471_v62  ;;  %v523_v22 = vmul.f32 3.8918573e-05, %v511_v16  ;;  %v476_v27 = vmul.f32 %v475_v19, %v471_v62 }
 0x2af   :  { %v513_v25 = vadd.f32 0.00028619796, %v512_v20  ;;  %v488_v26 = vadd.f32 0.112945676, %v487_v21  ;;  %v524_v29 = vadd.f32 0.001143296, %v523_v22 }
 0x2b0   :  { %v477_v34 = vadd.f32 0.05243302, %v476_v27 }
 0x2b1   :  { %v514_v30 = vmul.f32 %v513_v25, %v511_v16  ;;  %v489_v31 = vmul.f32 %v488_v26, %v471_v62  ;;  %v525_v32 = vmul.f32 %v524_v29, %v511_v16 }
 0x2b2   :  { %v478_v42 = vmul.f32 %v477_v34, %v471_v62 }
 0x2b3   :  { %v490_v33 = vadd.f32 0.4994258, %v489_v31  ;;  %v526_v35 = vadd.f32 0.014752088, %v525_v32  ;;  %v515_v37 = vadd.f32 0.0036580483, %v514_v30 }
 0x2b4   :  { %v479_v44 = vadd.f32 0.18741608, %v478_v42 }
 0x2b5   :  { %v491_v38 = vmul.f32 %v490_v33, %v471_v62  ;;  %v527_v39 = vmul.f32 %v526_v35, %v511_v16  ;;  %v516_v43 = vmul.f32 %v515_v37, %v511_v16 }
 0x2b6   :  { %v480_v49 = vmul.f32 %v479_v44, %v471_v62 }
 0x2b7   :  { %v492_v40 = vadd.f32 1.0, %v491_v38  ;;  %v528_v4 = vadd.f32 0.112945676, %v527_v39  ;;  %v517_v46 = vadd.f32 0.05243302, %v516_v43 }
 0x2b8   :  { %v481_v53 = vadd.f32 1.1283791, %v480_v49 }
 0x2b9   :  { %947 = vrcp.f32 %v492_v40  ;;  %v529_v6 = vmul.f32 %v528_v4, %v511_v16  ;;  %v518_v50 = vmul.f32 %v517_v46, %v511_v16  ;;  %v504_v52 = vand.u32 2147483648, %v492_v40 }
 0x2ba   :  { %v502_v56 = vand.u32 2147483647, %v492_v40  ;;  %vm498_vm0 = vweird.f32 %v492_v40  ;;  %v482_v61 = vmul.f32 %v481_v53, %v1225_v57 }
 0x2bb   :  { %v530_v45 = vadd.f32 0.4994258, %v529_v6  ;;  %v519_v23 = vadd.f32 0.18741608, %v518_v50  ;;  %v505_v59 = vor.u32 1.1754944e-38, %v504_v52 }
 0x2bc   :  { %vm503_vm2 = vcmp.eq.f32.partialorder %v502_v56, 8.507059e+37 }
 0x2bd   :  { %v531_v47 = vmul.f32 %v530_v45, %v511_v16  ;;  %v520_v62 = vmul.f32 %v519_v23, %v511_v16 }
 0x2bf   :  { %v948_v48 = vpop.eup %947  ;;  %v532_v5 = vadd.f32 1.0, %v531_v47  ;;  %v521_v11 = vadd.f32 1.1283791, %v520_v62 }
 0x2c0   :  { %v494_v3 = vmul.f32 %v948_v48, %v492_v40  ;;  %vm499_vm15 = vweird.f32 %v948_v48 }
 0x2c1   :  { %949 = vrcp.f32 %v532_v5  ;;  %vm500_vm1 = vmor %vm498_vm0, %vm499_vm15  ;;  %v544_v28 = vand.u32 2147483648, %v532_v5  ;;  %v542_v13 = vand.u32 2147483647, %v532_v5  ;;  %vm538_vm4 = vweird.f32 %v532_v5 }
 0x2c2   :  { %v495_v51 = vsub.f32 1.0, %v494_v3  ;;  %v522_v16 = vmul.f32 %v521_v11, %v1248_v9 }
 0x2c3   :  { %v545_v57 = vor.u32 1.1754944e-38, %v544_v28  ;;  %vm543_vm6 = vcmp.eq.f32.partialorder %v542_v13, 8.507059e+37 }
 0x2c4   :  { %v496_v54 = vmul.f32 %v948_v48, %v495_v51 }
 0x2c6   :  { %v497_v58 = vadd.f32 %v948_v48, %v496_v54 }
 0x2c7   :  { %v950_v60 = vpop.eup %949 }
 0x2c8   :  { %v501_v63 = vsel %vm500_vm1, %v948_v48, %v497_v58  ;;  %v534_v2 = vmul.f32 %v950_v60, %v532_v5  ;;  %vm539_vm3 = vweird.f32 %v950_v60 }
 0x2c9   :  { %v506_v0 = vsel %vm503_vm2, %v505_v59, %v501_v63  ;;  %vm540_vm5 = vmor %vm538_vm4, %vm539_vm3 }
 0x2ca   :  { %v507_v7 = vmul.f32 %v506_v0, %v482_v61  ;;  %v535_v8 = vsub.f32 1.0, %v534_v2 }
 0x2cc   :  { %v872_v10 = vclamps-f32 %v507_v7, 1.0  ;;  %v536_v12 = vmul.f32 %v950_v60, %v535_v8 }
 0x2ce   :  { %v550_v15 = vadd.f32 1.0, %v872_v10  ;;  %v537_v17 = vadd.f32 %v950_v60, %v536_v12 }
 0x2d0   :  { %v552_v18 = vmul.f32 %v550_v15, %v466_v14  ;;  %v541_v19 = vsel %vm540_vm5, %v950_v60, %v537_v17 }
 0x2d1   :  { %v546_v20 = vsel %vm543_vm6, %v545_v57, %v541_v19 }
 0x2d2   :  { %590 = vmatmul.f32.vlgmr.msra.gmra.mxu3 %v552_v18  ;;  %v547_v21 = vmul.f32 %v546_v20, %v522_v16 }
 0x2d4   :  { %v873_v22 = vclamps-f32 %v547_v21, 1.0 }
 0x2d6   :  { %v551_v25 = vadd.f32 1.0, %v873_v22 }
 0x2d8   :  { %v553_v26 = vmul.f32 %v551_v25, %v467_v24 }
 0x2da   :  { %593 = vmatmul.f32.gmra.mxu3 %v553_v26 }
 0x355   :  { %v591_v27 = vpop.f32.mrf.mxu3 }
 0x356   :  { %v592_v29 = vadd.f32 %v946_v55, %v591_v27 }
 0x358   :  { %v597_v30 = vadd.f32 %v592_v29, %v1092_v36 }
 0x35a   :  { %599 = vst.msk [vmem:[#allocation3] sm:$0xff] %vm169_vm10, %v597_v30 }
 0x35d   :  { %v594_v9 = vpop.f32.mrf.mxu3 }
 0x35e   :  { %v595_v31 = vadd.f32 %v946_v55, %v594_v9 }
 0x360   :  { %v598_v32 = vadd.f32 %v595_v31, %v1108_v41 }
 0x362   :  { %600 = vst.msk [vmem:[#allocation3 + $0x8] sm:$0xff] %vm169_vm10, %v598_v32 }
 0x363 LB: > { %s607_s26 = sld [smem:[#allocation6 + %s995_s25]]  ;;  %p608_p6 = scmp.lt.s32.totalorder %s995_s25, 0  ;;  %s995_s25 = sphi %s993_s25, %s606_s25  }
 0x364   : > { %s609_s27 = ssub.s32 0, %s995_s25  ;;  %s620_s30 = scalar_lea.vmem [#allocation3], %s995_s25 }
 0x365   : > { %s874_s7 = smin.u32 %s995_s25, %s609_s27 }
 0x366   : > { %s611_s28 = sand.u32 7, %s874_s7  }
 0x367   : > { %s612_s29 = ssub.s32 0, %s611_s28 }
 0x368   : > { %s1296_s29 = smov (!%p608_p6, %s612_s29), %s611_s28 }
 0x369   : > { %v637_v36 = vld [vmem:[%s620_s30] sm:$0x1]  ;;  %s621_s11 = scalar_lea.vmem %s1286_s8, %s607_s26  ;;  %p876_p7 = scmp.lt.s32.totalorder %s1296_s29, 0 }
 0x36a   : > { %s618_s5 = sadd.s32 8, %s1296_s29  ;;  %638 = vst [vmem:[%s621_s11] sm:$0x1] %v637_v36 }
 0x36b   : > { %s1298_s5 = smov (!%p876_p7, %s618_s5), %s1296_s29 }
 0x36c   : > { %s622_s12 = scalar_lea.sflag [#allocation5], %s1298_s5 }
 0x36d   : > { %656 = vsyncadd %s622_s12, 16  ;;  %s606_s25 = sadd.s32 1, %s995_s25  }
 0x36e   : > { %p603_p8 = scmp.ge.s32.totalorder %s606_s25, 16  }
 0x36f   :  { %s997_s13 = smov (%p603_p8), 0  }
 0x370   :  { %605 = sbr.rel (!%p603_p8) target bundleno = 867 (0x363), region = 184 }
 0x375 LB: > { %p663_p9 = scmp.lt.s32.totalorder %s999_s13, 0  ;;  %s664_s14 = ssub.s32 0, %s999_s13  ;;  %s999_s13 = sphi %s997_s13, %s662_s13  }
 0x376   : > { %s877_s15 = smin.u32 %s999_s13, %s664_s14 }
 0x377   : > { %s666_s16 = sand.u32 7, %s877_s15  }
 0x378   : > { %s667_s0 = ssub.s32 0, %s666_s16 }
 0x379   : > { %s1300_s0 = smov (!%p663_p9, %s667_s0), %s666_s16 }
 0x37a   : > { %p879_p10 = scmp.lt.s32.totalorder %s1300_s0, 0  ;;  %s673_s17 = sadd.s32 8, %s1300_s0 }
 0x37c   : > { %s1302_s17 = smov (!%p879_p10, %s673_s17), %s1300_s0 }
 0x37d   : > { %s675_s18 = scalar_lea.sflag [#allocation5], %s1302_s17 }
 0x37e   : > { %983 = dma.done.wait %s675_s18, 16 }
 0x37f   : > { %984 = vsyncadd %s675_s18, 4294967280  ;;  %s662_s13 = sadd.s32 1, %s999_s13  }
 0x380   : > { %p659_p11 = scmp.ge.s32.totalorder %s662_s13, 16  }
 0x382   :  { %661 = sbr.rel (!%p659_p11) target bundleno = 885 (0x375), region = 195 }
 0x387   :  { %679 = vsyncpa [#allocation7], 1 }
 0x388   :  { %680 = vsyncmov [#allocation4] }
 0x38b   :  { %s681_s8 = vpop.sfrf %680 }
 0x38c   :  { %p880_p12 = scmp.ne.s32.totalorder %s681_s8, 0 }
 0x38e   :  { %685 = shalt.err (%p880_p12)  }
 0x38f   :  { %687 = vsyncmov [#allocation4 + $0x1] }
 0x392   :  { %s688_s19 = vpop.sfrf %687 }
 0x393   :  { %p881_p13 = scmp.ne.s32.totalorder %s688_s19, 0 }
 0x395   :  { %692 = shalt.err (%p881_p13)  }
 0x396   :  { %694 = vsyncmov [#allocation4 + $0x2] }
 0x399   :  { %s695_s1 = vpop.sfrf %694 }
 0x39a   :  { %p882_p0 = scmp.ne.s32.totalorder %s695_s1, 0 }
 0x39c   :  { %699 = shalt.err (%p882_p0)  }
 0x39d   :  { %701 = vsyncmov [#allocation4 + $0x3] }
 0x3a0   :  { %s702_s20 = vpop.sfrf %701 }
 0x3a1   :  { %p883_p1 = scmp.ne.s32.totalorder %s702_s20, 0 }
 0x3a3   :  { %706 = shalt.err (%p883_p1)  }
 0x3a4   :  { %708 = vsyncmov [#allocation4 + $0x4] }
 0x3a7   :  { %s709_s21 = vpop.sfrf %708 }
 0x3a8   :  { %p884_p2 = scmp.ne.s32.totalorder %s709_s21, 0 }
 0x3aa   :  { %713 = shalt.err (%p884_p2)  }
 0x3ab   :  { %715 = vsyncmov [#allocation4 + $0x5] }
 0x3ae   :  { %s716_s4 = vpop.sfrf %715 }
 0x3af   :  { %p885_p3 = scmp.ne.s32.totalorder %s716_s4, 0 }
 0x3b1   :  { %720 = shalt.err (%p885_p3)  }
 0x3b2   :  { %722 = vsyncmov [#allocation4 + $0x6] }
 0x3b5   :  { %s723_s3 = vpop.sfrf %722 }
 0x3b6   :  { %p886_p4 = scmp.ne.s32.totalorder %s723_s3, 0 }
 0x3b8   :  { %727 = shalt.err (%p886_p4)  }
 0x3b9   :  { %729 = vsyncmov [#allocation4 + $0x7] }
 0x3bc   :  { %s730_s22 = vpop.sfrf %729 }
 0x3bd   :  { %p887_p5 = scmp.ne.s32.totalorder %s730_s22, 0 }
 0x3bf   :  { %734 = shalt.err (%p887_p5)  }
 0x3c0   :  { %735 = vsyncmov [#allocation5] }
 0x3c3   :  { %s736_s2 = vpop.sfrf %735 }
 0x3c4   :  { %p888_p6 = scmp.ne.s32.totalorder %s736_s2, 0 }
 0x3c6   :  { %740 = shalt.err (%p888_p6)  }
 0x3c7   :  { %742 = vsyncmov [#allocation5 + $0x1] }
 0x3ca   :  { %s743_s23 = vpop.sfrf %742 }
 0x3cb   :  { %p889_p7 = scmp.ne.s32.totalorder %s743_s23, 0 }
 0x3cd   :  { %747 = shalt.err (%p889_p7)  }
 0x3ce   :  { %749 = vsyncmov [#allocation5 + $0x2] }
 0x3d1   :  { %s750_s6 = vpop.sfrf %749 }
 0x3d2   :  { %p890_p8 = scmp.ne.s32.totalorder %s750_s6, 0 }
 0x3d4   :  { %754 = shalt.err (%p890_p8)  }
 0x3d5   :  { %756 = vsyncmov [#allocation5 + $0x3] }
 0x3d8   :  { %s757_s24 = vpop.sfrf %756 }
 0x3d9   :  { %p891_p9 = scmp.ne.s32.totalorder %s757_s24, 0 }
 0x3db   :  { %761 = shalt.err (%p891_p9)  }
 0x3dc   :  { %763 = vsyncmov [#allocation5 + $0x4] }
 0x3df   :  { %s764_s25 = vpop.sfrf %763 }
 0x3e0   :  { %p892_p10 = scmp.ne.s32.totalorder %s764_s25, 0 }
 0x3e2   :  { %768 = shalt.err (%p892_p10)  }
 0x3e3   :  { %770 = vsyncmov [#allocation5 + $0x5] }
 0x3e6   :  { %s771_s26 = vpop.sfrf %770 }
 0x3e7   :  { %p893_p11 = scmp.ne.s32.totalorder %s771_s26, 0 }
 0x3e9   :  { %775 = shalt.err (%p893_p11)  }
 0x3ea   :  { %777 = vsyncmov [#allocation5 + $0x6] }
 0x3ed   :  { %s778_s27 = vpop.sfrf %777 }
 0x3ee   :  { %p894_p12 = scmp.ne.s32.totalorder %s778_s27, 0 }
 0x3f0   :  { %782 = shalt.err (%p894_p12)  }
 0x3f1   :  { %784 = vsyncmov [#allocation5 + $0x7] }
 0x3f4   :  { %s785_s7 = vpop.sfrf %784 }
 0x3f5   :  { %p895_p13 = scmp.ne.s32.totalorder %s785_s7, 0 }
 0x3f7   :  { %789 = shalt.err (%p895_p13)  }

</bundles_post_ra>
